<compile_context>
chip_gen: v6e
topology: v6e:2x2x1
jax: 0.10.0
libtpu: 0.0.40
codegen_flags: <defaults>
</compile_context>

<pallas_src>
import functools

import jax
import jax.numpy as jnp
from jax import lax
from jax.experimental import pallas as pl
from jax.experimental.pallas import tpu as pltpu

# Row indices inside the packed (8, D) vector stack.
_BO, _LN1G, _LN1B, _B2, _LN2G, _LN2B, _BB, _BOUT = range(8)


def _transformer_board_kernel(
    moves_ref, board_ref,
    w_qkv_ref, b_qkv_ref,
    w_o_ref, w_ff1_ref, b_ff1_ref, w_ff2_ref,
    w_board_ref, w_out_ref,
    vecs_ref,
    out_ref,
    *, mm_dtype,
):
    eps = 1e-5
    x0 = moves_ref[...]                                   # (S, D) f32
    S, D = x0.shape

    def cast(x):
        return x.astype(mm_dtype)                         # no-op when mm_dtype == f32

    # ---- fused Q/K/V projection: one MXU pass ----
    qkv = jnp.dot(cast(x0), cast(w_qkv_ref[...]),
                  preferred_element_type=jnp.float32) + b_qkv_ref[...]      # (S, 3D)
    q = qkv[:, :D]
    k = qkv[:, D:2 * D]
    v = qkv[:, 2 * D:]

    # ---- single-head self-attention over the S positions (batch = 1) ----
    scale = 1.0 / jnp.sqrt(jnp.float32(D))
    scores = lax.dot_general(q, k, (((1,), (1,)), ((), ())),
                             preferred_element_type=jnp.float32) * scale    # (S, S)
    m = jnp.max(scores, axis=-1, keepdims=True)
    p = jnp.exp(scores - m)
    inv_denom = pl.reciprocal(jnp.sum(p, axis=-1, keepdims=True), approx=True)
    attn = p * inv_denom
    a = jnp.dot(cast(attn), cast(v), preferred_element_type=jnp.float32)    # (S, D)
    a = jnp.dot(cast(a), cast(w_o_ref[...]),
                preferred_element_type=jnp.float32) + vecs_ref[pl.ds(_BO, 1), :]

    # ---- residual + LayerNorm1 (post-norm; eval-mode dropout = identity) ----
    h = x0 + a
    mu = jnp.mean(h, axis=-1, keepdims=True)
    var = jnp.mean((h - mu) * (h - mu), axis=-1, keepdims=True)
    h1 = (h - mu) * lax.rsqrt(var + eps)
    h1 = h1 * vecs_ref[pl.ds(_LN1G, 1), :] + vecs_ref[pl.ds(_LN1B, 1), :]

    # ---- feed-forward (ReLU) ----
    ff = jnp.dot(cast(h1), cast(w_ff1_ref[...]),
                 preferred_element_type=jnp.float32) + b_ff1_ref[...]
    ff = jnp.maximum(ff, 0.0)
    ff = jnp.dot(cast(ff), cast(w_ff2_ref[...]),
                 preferred_element_type=jnp.float32) + vecs_ref[pl.ds(_B2, 1), :]

    # ---- residual + LayerNorm2 ----
    h2 = h1 + ff
    mu2 = jnp.mean(h2, axis=-1, keepdims=True)
    var2 = jnp.mean((h2 - mu2) * (h2 - mu2), axis=-1, keepdims=True)
    x2 = (h2 - mu2) * lax.rsqrt(var2 + eps)
    x2 = x2 * vecs_ref[pl.ds(_LN2G, 1), :] + vecs_ref[pl.ds(_LN2B, 1), :]

    # ---- board path: relu(linear_board(board)) ----
    bpath = jnp.dot(cast(board_ref[...]), cast(w_board_ref[...]),
                    preferred_element_type=jnp.float32) + vecs_ref[pl.ds(_BB, 1), :]
    bpath = jnp.maximum(bpath, 0.0)

    hidden = x2 + bpath                                   # (S, D)

    # ---- output head: (1,D) x (S,D)^T -> lane-dense (1, S) row ----
    b_out = vecs_ref[pl.ds(_BOUT, 1), pl.ds(0, 1)]        # (1, 1)
    logits = lax.dot_general(w_out_ref[...], hidden, (((1,), (1,)), ((), ())),
                             preferred_element_type=jnp.float32) + b_out    # (1, S)
    out_ref[...] = logits


def init_params(key, f_board, d_model, hidden):
    """PyTorch-layout parameters (weights stored (out, in) like nn.Linear)."""
    ks = jax.random.split(key, 12)

    def rnd(k, shape, scale=0.05):
        return jax.random.normal(k, shape, dtype=jnp.float32) * scale

    return dict(
        in_proj_w=rnd(ks[0], (3 * d_model, d_model)),
        in_proj_b=rnd(ks[1], (3 * d_model,)),
        out_proj_w=rnd(ks[2], (d_model, d_model)),
        out_proj_b=rnd(ks[3], (d_model,)),
        ln1_g=jnp.ones((d_model,), jnp.float32),
        ln1_b=jnp.zeros((d_model,), jnp.float32),
        ln2_g=jnp.ones((d_model,), jnp.float32),
        ln2_b=jnp.zeros((d_model,), jnp.float32),
        lin1_w=rnd(ks[4], (hidden, d_model)),
        lin1_b=rnd(ks[5], (hidden,)),
        lin2_w=rnd(ks[6], (d_model, hidden)),
        lin2_b=rnd(ks[7], (d_model,)),
        board_w=rnd(ks[8], (d_model, f_board)),
        board_b=rnd(ks[9], (d_model,)),
        out_w=rnd(ks[10], (1, d_model)),
        out_b=rnd(ks[11], (1,)),
    )


def pack_params(params, matmul_dtype=jnp.float32):
    """One-time packing: fuse QKV, pre-transpose to (in, out), stack small vectors."""
    p = params
    d_model = p["out_proj_w"].shape[0]
    w_qkv = p["in_proj_w"].T.astype(matmul_dtype)                    # (D, 3D)
    b_qkv = p["in_proj_b"].reshape(1, -1).astype(jnp.float32)        # (1, 3D)
    vecs = jnp.zeros((8, d_model), jnp.float32)
    vecs = vecs.at[_BO].set(p["out_proj_b"])
    vecs = vecs.at[_LN1G].set(p["ln1_g"])
    vecs = vecs.at[_LN1B].set(p["ln1_b"])
    vecs = vecs.at[_B2].set(p["lin2_b"])
    vecs = vecs.at[_LN2G].set(p["ln2_g"])
    vecs = vecs.at[_LN2B].set(p["ln2_b"])
    vecs = vecs.at[_BB].set(p["board_b"])
    vecs = vecs.at[_BOUT, 0].set(p["out_b"][0])
    return dict(
        w_qkv=w_qkv,
        b_qkv=b_qkv,
        w_o=p["out_proj_w"].T.astype(matmul_dtype),                  # (D, D)
        w_ff1=p["lin1_w"].T.astype(matmul_dtype),                    # (D, H)
        b_ff1=p["lin1_b"].reshape(1, -1).astype(jnp.float32),        # (1, H)
        w_ff2=p["lin2_w"].T.astype(matmul_dtype),                    # (H, D)
        w_board=p["board_w"].T.astype(matmul_dtype),                 # (F, D)
        w_out=p["out_w"].astype(matmul_dtype),                       # (1, D) row
        vecs=vecs,                                                   # (8, D)
    )


def transformer_board_forward(board, sf_eval, moves, packed, *,
                              matmul_dtype=jnp.float32):
    """Forward of TransformerBoard.

    Single game: board (S, 1, F), moves (S, D) -> logits (S,)   (PyTorch semantics)
    Batched:     board (B, S, 1, F) or (B, S, F), moves (B, S, D) -> logits (B, S)
    """
    del sf_eval  # unused by the PyTorch forward
    single = moves.ndim == 2
    if single:
        moves = moves[None]
        board = board[None]
    B, S, D = moves.shape
    boards2d = board.reshape(B, S, -1).astype(jnp.float32)
    moves = moves.astype(jnp.float32)
    F = boards2d.shape[-1]
    H = packed["w_ff1"].shape[-1]

    kernel = functools.partial(_transformer_board_kernel, mm_dtype=matmul_dtype)

    # Resident-weight spec: constant index_map => DMA'd once, stays in VMEM over the grid.
    def const(shape):
        n = len(shape)
        return pl.BlockSpec(shape, lambda b, _n=n: (0,) * _n)

    flops = B * (2 * S * (3 * D) * D        # fused QKV
                 + 2 * S * S * D * 2        # q@k^T and attn@v
                 + 2 * S * D * D            # attn out proj
                 + 2 * S * H * D * 2        # feed-forward
                 + 2 * S * D * F            # board path
                 + 2 * S * D)               # output head
    bytes_accessed = int(
        4 * (moves.size + boards2d.size + B * S)
        + sum(v.size * v.dtype.itemsize for v in packed.values()))
    cost = pl.CostEstimate(flops=flops, transcendentals=B * S * S,
                           bytes_accessed=bytes_accessed)

    out = pl.pallas_call(
        kernel,
        out_shape=jax.ShapeDtypeStruct((B, 1, S), jnp.float32),
        grid=(B,),
        in_specs=[
            pl.BlockSpec((None, S, D), lambda b: (b, 0, 0)),   # moves[b]
            pl.BlockSpec((None, S, F), lambda b: (b, 0, 0)),   # board[b]
            const((D, 3 * D)),                                 # w_qkv
            const((1, 3 * D)),                                 # b_qkv
            const((D, D)),                                     # w_o
            const((D, H)),                                     # w_ff1
            const((1, H)),                                     # b_ff1
            const((H, D)),                                     # w_ff2
            const((F, D)),                                     # w_board
            const((1, D)),                                     # w_out
            const((8, D)),                                     # packed bias/LN vectors
        ],
        out_specs=pl.BlockSpec((None, 1, S), lambda b: (b, 0, 0)),
        compiler_params=pltpu.CompilerParams(
            dimension_semantics=("parallel",)),                # v7x: split batch over TCs
        cost_estimate=cost,
    )(moves, boards2d,
      packed["w_qkv"], packed["b_qkv"], packed["w_o"],
      packed["w_ff1"], packed["b_ff1"], packed["w_ff2"],
      packed["w_board"], packed["w_out"], packed["vecs"])

    out = out.reshape(B, S)
    return out[0] if single else out


def reference_forward(board, sf_eval, moves, params):
    """Pure-JAX mirror of the PyTorch forward (eval mode) for one game."""
    del sf_eval
    p = params
    x0 = moves.astype(jnp.float32)
    S, D = x0.shape
    eps = 1e-5
    wq, wk, wv = jnp.split(p["in_proj_w"], 3, axis=0)
    bq, bk, bv = jnp.split(p["in_proj_b"], 3, axis=0)
    q, k, v = x0 @ wq.T + bq, x0 @ wk.T + bk, x0 @ wv.T + bv
    attn = jax.nn.softmax((q @ k.T) / jnp.sqrt(jnp.float32(D)), axis=-1)
    a = (attn @ v) @ p["out_proj_w"].T + p["out_proj_b"]
    h = x0 + a
    h1 = (h - h.mean(-1, keepdims=True)) * lax.rsqrt(h.var(-1, keepdims=True) + eps)
    h1 = h1 * p["ln1_g"] + p["ln1_b"]
    ff = jnp.maximum(h1 @ p["lin1_w"].T + p["lin1_b"], 0.0) @ p["lin2_w"].T + p["lin2_b"]
    h2 = h1 + ff
    x2 = (h2 - h2.mean(-1, keepdims=True)) * lax.rsqrt(h2.var(-1, keepdims=True) + eps)
    x2 = x2 * p["ln2_g"] + p["ln2_b"]
    bpath = jnp.maximum(board.reshape(S, -1) @ p["board_w"].T + p["board_b"], 0.0)
    hidden = x2 + bpath
    return (hidden @ p["out_w"].T + p["out_b"]).reshape(S)


if __name__ == "__main__":
    B, S, F_BOARD, D_MODEL, HIDDEN = 4, 8, 16, 32, 64

    key = jax.random.PRNGKey(0)
    k_board, k_eval, k_moves, k_params = jax.random.split(key, 4)
    boards = jax.random.normal(k_board, (B, S, 1, F_BOARD), jnp.float32)
    sf_evals = jax.random.normal(k_eval, (B, S, 1), jnp.float32)   # unused by forward
    moves = jax.random.normal(k_moves, (B, S, D_MODEL), jnp.float32)

    params = init_params(k_params, F_BOARD, D_MODEL, HIDDEN)
    packed = pack_params(params)     # one-time packing, not per forward

    # Batched call: grid over games, weights resident in VMEM, batch axis "parallel".
    logits_b = transformer_board_forward(boards, sf_evals, moves, packed)
    jax.block_until_ready(logits_b)
    assert logits_b.shape == (B, S)

    # Single-game call, identical to the original PyTorch forward signature.
    logits_0 = transformer_board_forward(boards[0], sf_evals[0], moves[0], packed)
    jax.block_until_ready(logits_0)
    assert logits_0.shape == (S,)

    ref = jnp.stack([reference_forward(boards[i], sf_evals[i], moves[i], params)
                     for i in range(B)])
    assert jnp.allclose(logits_b, ref, atol=1e-2, rtol=1e-2), (logits_b, ref)
    assert jnp.allclose(logits_0, ref[0], atol=1e-2, rtol=1e-2), (logits_0, ref[0])
    print("KERNEL_OK")
</pallas_src>

<mosaic_0001>
module attributes {stable_mosaic.version = 11 : i64} {
  func.func @_transformer_board_kernel(%arg0: i32, %arg1: memref<1x8x32xf32, #tpu.memory_space<vmem>>, %arg2: memref<1x8x16xf32, #tpu.memory_space<vmem>>, %arg3: memref<32x96xf32, #tpu.memory_space<vmem>>, %arg4: memref<1x96xf32, #tpu.memory_space<vmem>>, %arg5: memref<32x32xf32, #tpu.memory_space<vmem>>, %arg6: memref<32x64xf32, #tpu.memory_space<vmem>>, %arg7: memref<1x64xf32, #tpu.memory_space<vmem>>, %arg8: memref<64x32xf32, #tpu.memory_space<vmem>>, %arg9: memref<16x32xf32, #tpu.memory_space<vmem>>, %arg10: memref<1x32xf32, #tpu.memory_space<vmem>>, %arg11: memref<8x32xf32, #tpu.memory_space<vmem>>, %arg12: memref<1x1x8xf32, #tpu.memory_space<vmem>>) attributes {dimension_semantics = [#tpu.dimension_semantics<parallel>], iteration_bounds = array<i64: 4>, scalar_prefetch = 0 : i64, scratch_operands = 0 : i64, tpu.core_type = #tpu.core_type<tc>, window_params = [{transform_indices = @transform_0, window_bounds = array<i64: 1, 8, 32>}, {transform_indices = @transform_1, window_bounds = array<i64: 1, 8, 16>}, {pipeline_mode = #tpu.pipeline_mode<synchronous>, transform_indices = @transform_2, window_bounds = array<i64: 32, 96>}, {pipeline_mode = #tpu.pipeline_mode<synchronous>, transform_indices = @transform_3, window_bounds = array<i64: 1, 96>}, {pipeline_mode = #tpu.pipeline_mode<synchronous>, transform_indices = @transform_4, window_bounds = array<i64: 32, 32>}, {pipeline_mode = #tpu.pipeline_mode<synchronous>, transform_indices = @transform_5, window_bounds = array<i64: 32, 64>}, {pipeline_mode = #tpu.pipeline_mode<synchronous>, transform_indices = @transform_6, window_bounds = array<i64: 1, 64>}, {pipeline_mode = #tpu.pipeline_mode<synchronous>, transform_indices = @transform_7, window_bounds = array<i64: 64, 32>}, {pipeline_mode = #tpu.pipeline_mode<synchronous>, transform_indices = @transform_8, window_bounds = array<i64: 16, 32>}, {pipeline_mode = #tpu.pipeline_mode<synchronous>, transform_indices = @transform_9, window_bounds = array<i64: 1, 32>}, {pipeline_mode = #tpu.pipeline_mode<synchronous>, transform_indices = @transform_10, window_bounds = array<i64: 8, 32>}, {transform_indices = @transform_11, window_bounds = array<i64: 1, 1, 8>}]} {
    %c0 = arith.constant 0 : index
    %c0_0 = arith.constant 0 : index
    %c0_1 = arith.constant 0 : index
    %0 = vector.load %arg1[%c0, %c0_0, %c0_1] : memref<1x8x32xf32, #tpu.memory_space<vmem>>, vector<1x8x32xf32>
    %1 = vector.shape_cast %0 : vector<1x8x32xf32> to vector<8x32xf32>
    %c0_2 = arith.constant 0 : index
    %c0_3 = arith.constant 0 : index
    %2 = vector.load %arg3[%c0_2, %c0_3] : memref<32x96xf32, #tpu.memory_space<vmem>>, vector<32x96xf32>
    %cst = arith.constant dense<0.000000e+00> : vector<8x96xf32>
    %3 = tpu.matmul %1, %2, %cst {dimension_numbers = #tpu.dot_dimension_numbers<[1], [0], [0], [1], [0, 0, 1, 1], [], []>} : vector<8x32xf32>, vector<32x96xf32>, vector<8x96xf32> -> vector<8x96xf32>
    %c0_4 = arith.constant 0 : index
    %c0_5 = arith.constant 0 : index
    %4 = vector.load %arg4[%c0_4, %c0_5] : memref<1x96xf32, #tpu.memory_space<vmem>>, vector<1x96xf32>
    %5 = vector.broadcast %4 : vector<1x96xf32> to vector<8x96xf32>
    %6 = arith.addf %3, %5 : vector<8x96xf32>
    %7 = vector.extract_strided_slice %6 {offsets = [0, 0], sizes = [8, 32], strides = [1, 1]} : vector<8x96xf32> to vector<8x32xf32>
    %8 = vector.extract_strided_slice %6 {offsets = [0, 32], sizes = [8, 32], strides = [1, 1]} : vector<8x96xf32> to vector<8x32xf32>
    %9 = vector.extract_strided_slice %6 {offsets = [0, 64], sizes = [8, 32], strides = [1, 1]} : vector<8x96xf32> to vector<8x32xf32>
    %cst_6 = arith.constant 3.200000e+01 : f32
    %10 = math.sqrt %cst_6 : f32
    %cst_7 = arith.constant 1.000000e+00 : f32
    %11 = arith.divf %cst_7, %10 : f32
    %cst_8 = arith.constant dense<0.000000e+00> : vector<8x8xf32>
    %12 = tpu.matmul %7, %8, %cst_8 {dimension_numbers = #tpu.dot_dimension_numbers<[1], [1], [0], [0], [0, 0, 1, 0], [], []>} : vector<8x32xf32>, vector<8x32xf32>, vector<8x8xf32> -> vector<8x8xf32>
    %13 = vector.broadcast %11 : f32 to vector<8x8xf32>
    %14 = arith.mulf %12, %13 : vector<8x8xf32>
    %cst_9 = arith.constant dense<0xFF800000> : vector<8xf32>
    %15 = vector.multi_reduction <maximumf>, %14, %cst_9 [1] : vector<8x8xf32> to vector<8xf32>
    %16 = vector.shape_cast %15 : vector<8xf32> to vector<8x1xf32>
    %17 = vector.broadcast %16 : vector<8x1xf32> to vector<8x8xf32>
    %18 = arith.subf %14, %17 : vector<8x8xf32>
    %19 = math.exp %18 : vector<8x8xf32>
    %cst_10 = arith.constant dense<0.000000e+00> : vector<8xf32>
    %20 = vector.multi_reduction <add>, %19, %cst_10 [1] : vector<8x8xf32> to vector<8xf32>
    %21 = vector.shape_cast %20 : vector<8xf32> to vector<8x1xf32>
    %22 = tpu.reciprocal %21 {approx = true} : vector<8x1xf32> -> vector<8x1xf32>
    %23 = vector.broadcast %22 : vector<8x1xf32> to vector<8x8xf32>
    %24 = arith.mulf %19, %23 : vector<8x8xf32>
    %cst_11 = arith.constant dense<0.000000e+00> : vector<8x32xf32>
    %25 = tpu.matmul %24, %9, %cst_11 {dimension_numbers = #tpu.dot_dimension_numbers<[1], [0], [0], [1], [0, 0, 1, 1], [], []>} : vector<8x8xf32>, vector<8x32xf32>, vector<8x32xf32> -> vector<8x32xf32>
    %c0_12 = arith.constant 0 : index
    %c0_13 = arith.constant 0 : index
    %26 = vector.load %arg5[%c0_12, %c0_13] : memref<32x32xf32, #tpu.memory_space<vmem>>, vector<32x32xf32>
    %cst_14 = arith.constant dense<0.000000e+00> : vector<8x32xf32>
    %27 = tpu.matmul %25, %26, %cst_14 {dimension_numbers = #tpu.dot_dimension_numbers<[1], [0], [0], [1], [0, 0, 1, 1], [], []>} : vector<8x32xf32>, vector<32x32xf32>, vector<8x32xf32> -> vector<8x32xf32>
    %c0_15 = arith.constant 0 : index
    %c0_16 = arith.constant 0 : index
    %28 = vector.load %arg11[%c0_15, %c0_16] : memref<8x32xf32, #tpu.memory_space<vmem>>, vector<1x32xf32>
    %29 = vector.broadcast %28 : vector<1x32xf32> to vector<8x32xf32>
    %30 = arith.addf %27, %29 : vector<8x32xf32>
    %31 = arith.addf %1, %30 : vector<8x32xf32>
    %cst_17 = arith.constant dense<0.000000e+00> : vector<8xf32>
    %32 = vector.multi_reduction <add>, %31, %cst_17 [1] : vector<8x32xf32> to vector<8xf32>
    %33 = vector.shape_cast %32 : vector<8xf32> to vector<8x1xf32>
    %cst_18 = arith.constant 3.200000e+01 : f32
    %34 = vector.broadcast %cst_18 : f32 to vector<8x1xf32>
    %35 = arith.divf %33, %34 : vector<8x1xf32>
    %36 = vector.broadcast %35 : vector<8x1xf32> to vector<8x32xf32>
    %37 = arith.subf %31, %36 : vector<8x32xf32>
    %38 = vector.broadcast %35 : vector<8x1xf32> to vector<8x32xf32>
    %39 = arith.subf %31, %38 : vector<8x32xf32>
    %40 = arith.mulf %37, %39 : vector<8x32xf32>
    %cst_19 = arith.constant dense<0.000000e+00> : vector<8xf32>
    %41 = vector.multi_reduction <add>, %40, %cst_19 [1] : vector<8x32xf32> to vector<8xf32>
    %42 = vector.shape_cast %41 : vector<8xf32> to vector<8x1xf32>
    %cst_20 = arith.constant 3.200000e+01 : f32
    %43 = vector.broadcast %cst_20 : f32 to vector<8x1xf32>
    %44 = arith.divf %42, %43 : vector<8x1xf32>
    %45 = vector.broadcast %35 : vector<8x1xf32> to vector<8x32xf32>
    %46 = arith.subf %31, %45 : vector<8x32xf32>
    %cst_21 = arith.constant 9.99999974E-6 : f32
    %47 = vector.broadcast %cst_21 : f32 to vector<8x1xf32>
    %48 = arith.addf %44, %47 : vector<8x1xf32>
    %49 = math.rsqrt %48 : vector<8x1xf32>
    %50 = vector.broadcast %49 : vector<8x1xf32> to vector<8x32xf32>
    %51 = arith.mulf %46, %50 : vector<8x32xf32>
    %c1 = arith.constant 1 : index
    %c0_22 = arith.constant 0 : index
    %52 = vector.load %arg11[%c1, %c0_22] : memref<8x32xf32, #tpu.memory_space<vmem>>, vector<1x32xf32>
    %53 = vector.broadcast %52 : vector<1x32xf32> to vector<8x32xf32>
    %54 = arith.mulf %51, %53 : vector<8x32xf32>
    %c2 = arith.constant 2 : index
    %c0_23 = arith.constant 0 : index
    %55 = vector.load %arg11[%c2, %c0_23] : memref<8x32xf32, #tpu.memory_space<vmem>>, vector<1x32xf32>
    %56 = vector.broadcast %55 : vector<1x32xf32> to vector<8x32xf32>
    %57 = arith.addf %54, %56 : vector<8x32xf32>
    %c0_24 = arith.constant 0 : index
    %c0_25 = arith.constant 0 : index
    %58 = vector.load %arg6[%c0_24, %c0_25] : memref<32x64xf32, #tpu.memory_space<vmem>>, vector<32x64xf32>
    %cst_26 = arith.constant dense<0.000000e+00> : vector<8x64xf32>
    %59 = tpu.matmul %57, %58, %cst_26 {dimension_numbers = #tpu.dot_dimension_numbers<[1], [0], [0], [1], [0, 0, 1, 1], [], []>} : vector<8x32xf32>, vector<32x64xf32>, vector<8x64xf32> -> vector<8x64xf32>
    %c0_27 = arith.constant 0 : index
    %c0_28 = arith.constant 0 : index
    %60 = vector.load %arg7[%c0_27, %c0_28] : memref<1x64xf32, #tpu.memory_space<vmem>>, vector<1x64xf32>
    %61 = vector.broadcast %60 : vector<1x64xf32> to vector<8x64xf32>
    %62 = arith.addf %59, %61 : vector<8x64xf32>
    %cst_29 = arith.constant 0.000000e+00 : f32
    %63 = vector.broadcast %cst_29 : f32 to vector<8x64xf32>
    %64 = arith.maximumf %62, %63 : vector<8x64xf32>
    %c0_30 = arith.constant 0 : index
    %c0_31 = arith.constant 0 : index
    %65 = vector.load %arg8[%c0_30, %c0_31] : memref<64x32xf32, #tpu.memory_space<vmem>>, vector<64x32xf32>
    %cst_32 = arith.constant dense<0.000000e+00> : vector<8x32xf32>
    %66 = tpu.matmul %64, %65, %cst_32 {dimension_numbers = #tpu.dot_dimension_numbers<[1], [0], [0], [1], [0, 0, 1, 1], [], []>} : vector<8x64xf32>, vector<64x32xf32>, vector<8x32xf32> -> vector<8x32xf32>
    %c3 = arith.constant 3 : index
    %c0_33 = arith.constant 0 : index
    %67 = vector.load %arg11[%c3, %c0_33] : memref<8x32xf32, #tpu.memory_space<vmem>>, vector<1x32xf32>
    %68 = vector.broadcast %67 : vector<1x32xf32> to vector<8x32xf32>
    %69 = arith.addf %66, %68 : vector<8x32xf32>
    %70 = arith.addf %57, %69 : vector<8x32xf32>
    %cst_34 = arith.constant dense<0.000000e+00> : vector<8xf32>
    %71 = vector.multi_reduction <add>, %70, %cst_34 [1] : vector<8x32xf32> to vector<8xf32>
    %72 = vector.shape_cast %71 : vector<8xf32> to vector<8x1xf32>
    %cst_35 = arith.constant 3.200000e+01 : f32
    %73 = vector.broadcast %cst_35 : f32 to vector<8x1xf32>
    %74 = arith.divf %72, %73 : vector<8x1xf32>
    %75 = vector.broadcast %74 : vector<8x1xf32> to vector<8x32xf32>
    %76 = arith.subf %70, %75 : vector<8x32xf32>
    %77 = vector.broadcast %74 : vector<8x1xf32> to vector<8x32xf32>
    %78 = arith.subf %70, %77 : vector<8x32xf32>
    %79 = arith.mulf %76, %78 : vector<8x32xf32>
    %cst_36 = arith.constant dense<0.000000e+00> : vector<8xf32>
    %80 = vector.multi_reduction <add>, %79, %cst_36 [1] : vector<8x32xf32> to vector<8xf32>
    %81 = vector.shape_cast %80 : vector<8xf32> to vector<8x1xf32>
    %cst_37 = arith.constant 3.200000e+01 : f32
    %82 = vector.broadcast %cst_37 : f32 to vector<8x1xf32>
    %83 = arith.divf %81, %82 : vector<8x1xf32>
    %84 = vector.broadcast %74 : vector<8x1xf32> to vector<8x32xf32>
    %85 = arith.subf %70, %84 : vector<8x32xf32>
    %cst_38 = arith.constant 9.99999974E-6 : f32
    %86 = vector.broadcast %cst_38 : f32 to vector<8x1xf32>
    %87 = arith.addf %83, %86 : vector<8x1xf32>
    %88 = math.rsqrt %87 : vector<8x1xf32>
    %89 = vector.broadcast %88 : vector<8x1xf32> to vector<8x32xf32>
    %90 = arith.mulf %85, %89 : vector<8x32xf32>
    %c4 = arith.constant 4 : index
    %c0_39 = arith.constant 0 : index
    %91 = vector.load %arg11[%c4, %c0_39] : memref<8x32xf32, #tpu.memory_space<vmem>>, vector<1x32xf32>
    %92 = vector.broadcast %91 : vector<1x32xf32> to vector<8x32xf32>
    %93 = arith.mulf %90, %92 : vector<8x32xf32>
    %c5 = arith.constant 5 : index
    %c0_40 = arith.constant 0 : index
    %94 = vector.load %arg11[%c5, %c0_40] : memref<8x32xf32, #tpu.memory_space<vmem>>, vector<1x32xf32>
    %95 = vector.broadcast %94 : vector<1x32xf32> to vector<8x32xf32>
    %96 = arith.addf %93, %95 : vector<8x32xf32>
    %c0_41 = arith.constant 0 : index
    %c0_42 = arith.constant 0 : index
    %c0_43 = arith.constant 0 : index
    %97 = vector.load %arg2[%c0_41, %c0_42, %c0_43] : memref<1x8x16xf32, #tpu.memory_space<vmem>>, vector<1x8x16xf32>
    %98 = vector.shape_cast %97 : vector<1x8x16xf32> to vector<8x16xf32>
    %c0_44 = arith.constant 0 : index
    %c0_45 = arith.constant 0 : index
    %99 = vector.load %arg9[%c0_44, %c0_45] : memref<16x32xf32, #tpu.memory_space<vmem>>, vector<16x32xf32>
    %cst_46 = arith.constant dense<0.000000e+00> : vector<8x32xf32>
    %100 = tpu.matmul %98, %99, %cst_46 {dimension_numbers = #tpu.dot_dimension_numbers<[1], [0], [0], [1], [0, 0, 1, 1], [], []>} : vector<8x16xf32>, vector<16x32xf32>, vector<8x32xf32> -> vector<8x32xf32>
    %c6 = arith.constant 6 : index
    %c0_47 = arith.constant 0 : index
    %101 = vector.load %arg11[%c6, %c0_47] : memref<8x32xf32, #tpu.memory_space<vmem>>, vector<1x32xf32>
    %102 = vector.broadcast %101 : vector<1x32xf32> to vector<8x32xf32>
    %103 = arith.addf %100, %102 : vector<8x32xf32>
    %cst_48 = arith.constant 0.000000e+00 : f32
    %104 = vector.broadcast %cst_48 : f32 to vector<8x32xf32>
    %105 = arith.maximumf %103, %104 : vector<8x32xf32>
    %106 = arith.addf %96, %105 : vector<8x32xf32>
    %c7 = arith.constant 7 : index
    %c0_49 = arith.constant 0 : index
    %107 = vector.load %arg11[%c7, %c0_49] : memref<8x32xf32, #tpu.memory_space<vmem>>, vector<1x1xf32>
    %c0_50 = arith.constant 0 : index
    %c0_51 = arith.constant 0 : index
    %108 = vector.load %arg10[%c0_50, %c0_51] : memref<1x32xf32, #tpu.memory_space<vmem>>, vector<1x32xf32>
    %cst_52 = arith.constant dense<0.000000e+00> : vector<1x8xf32>
    %109 = tpu.matmul %108, %106, %cst_52 {dimension_numbers = #tpu.dot_dimension_numbers<[1], [1], [0], [0], [0, 0, 1, 0], [], []>} : vector<1x32xf32>, vector<8x32xf32>, vector<1x8xf32> -> vector<1x8xf32>
    %110 = vector.broadcast %107 : vector<1x1xf32> to vector<1x8xf32>
    %111 = arith.addf %109, %110 : vector<1x8xf32>
    %c0_53 = arith.constant 0 : index
    %c0_54 = arith.constant 0 : index
    %c0_55 = arith.constant 0 : index
    %112 = vector.load %arg12[%c0_53, %c0_54, %c0_55] : memref<1x1x8xf32, #tpu.memory_space<vmem>>, vector<1x1x8xf32>
    %113 = vector.shape_cast %112 : vector<1x1x8xf32> to vector<1x8xf32>
    %114 = vector.shape_cast %111 : vector<1x8xf32> to vector<1x1x8xf32>
    tpu.vector_store %arg12[%c0_53, %c0_54, %c0_55], %114 {strides = array<i32>} : memref<1x1x8xf32, #tpu.memory_space<vmem>>, vector<1x1x8xf32>,
    return
  }
  func.func @transform_0(%arg0: i32) -> (i32, i32, i32) {
    %c0_i32 = arith.constant 0 : i32
    %c0_i32_0 = arith.constant 0 : i32
    %c0_i32_1 = arith.constant 0 : i32
    return %arg0, %c0_i32, %c0_i32_0 : i32, i32, i32
  }
  func.func @transform_1(%arg0: i32) -> (i32, i32, i32) {
    %c0_i32 = arith.constant 0 : i32
    %c0_i32_0 = arith.constant 0 : i32
    %c0_i32_1 = arith.constant 0 : i32
    return %arg0, %c0_i32, %c0_i32_0 : i32, i32, i32
  }
  func.func @transform_2(%arg0: i32) -> (i32, i32) {
    %c0_i32 = arith.constant 0 : i32
    %c0_i32_0 = arith.constant 0 : i32
    %c0_i32_1 = arith.constant 0 : i32
    return %c0_i32, %c0_i32_0 : i32, i32
  }
  func.func @transform_3(%arg0: i32) -> (i32, i32) {
    %c0_i32 = arith.constant 0 : i32
    %c0_i32_0 = arith.constant 0 : i32
    %c0_i32_1 = arith.constant 0 : i32
    return %c0_i32, %c0_i32_0 : i32, i32
  }
  func.func @transform_4(%arg0: i32) -> (i32, i32) {
    %c0_i32 = arith.constant 0 : i32
    %c0_i32_0 = arith.constant 0 : i32
    %c0_i32_1 = arith.constant 0 : i32
    return %c0_i32, %c0_i32_0 : i32, i32
  }
  func.func @transform_5(%arg0: i32) -> (i32, i32) {
    %c0_i32 = arith.constant 0 : i32
    %c0_i32_0 = arith.constant 0 : i32
    %c0_i32_1 = arith.constant 0 : i32
    return %c0_i32, %c0_i32_0 : i32, i32
  }
  func.func @transform_6(%arg0: i32) -> (i32, i32) {
    %c0_i32 = arith.constant 0 : i32
    %c0_i32_0 = arith.constant 0 : i32
    %c0_i32_1 = arith.constant 0 : i32
    return %c0_i32, %c0_i32_0 : i32, i32
  }
  func.func @transform_7(%arg0: i32) -> (i32, i32) {
    %c0_i32 = arith.constant 0 : i32
    %c0_i32_0 = arith.constant 0 : i32
    %c0_i32_1 = arith.constant 0 : i32
    return %c0_i32, %c0_i32_0 : i32, i32
  }
  func.func @transform_8(%arg0: i32) -> (i32, i32) {
    %c0_i32 = arith.constant 0 : i32
    %c0_i32_0 = arith.constant 0 : i32
    %c0_i32_1 = arith.constant 0 : i32
    return %c0_i32, %c0_i32_0 : i32, i32
  }
  func.func @transform_9(%arg0: i32) -> (i32, i32) {
    %c0_i32 = arith.constant 0 : i32
    %c0_i32_0 = arith.constant 0 : i32
    %c0_i32_1 = arith.constant 0 : i32
    return %c0_i32, %c0_i32_0 : i32, i32
  }
  func.func @transform_10(%arg0: i32) -> (i32, i32) {
    %c0_i32 = arith.constant 0 : i32
    %c0_i32_0 = arith.constant 0 : i32
    %c0_i32_1 = arith.constant 0 : i32
    return %c0_i32, %c0_i32_0 : i32, i32
  }
  func.func @transform_11(%arg0: i32) -> (i32, i32, i32) {
    %c0_i32 = arith.constant 0 : i32
    %c0_i32_0 = arith.constant 0 : i32
    %c0_i32_1 = arith.constant 0 : i32
    return %arg0, %c0_i32, %c0_i32_0 : i32, i32, i32
  }
}

</mosaic_0001>

<bundles_post_ra>
// kernel: tpu_custom_call.1
= control target key start
LH: loop header
LB: loop body
LE: loop exit
PB: predicated region body
PF: predicated region fallthrough
CT: control target
= control target key end

     0   :  { %16 = vsyncpa [#allocation3], 0  ;;  %s2003_s0 = inlined_call_operand.vmem [shape: f32[4,8,32], index: 0, kind: input, shape index: {}]   ;;  %s2004_s1 = inlined_call_operand.vmem [shape: f32[4,8,16], index: 1, kind: input, shape index: {}]   ;;  %s2005_s2 = inlined_call_operand.vmem [shape: f32[32,96], index: 2, kind: input, shape index: {}]   ;;  %s2006_s3 = inlined_call_operand.vmem [shape: f32[1,96], index: 3, kind: input, shape index: {}]   ;;  %s2007_s4 = inlined_call_operand.hbm [shape: f32[32,32], index: 4, kind: input, shape index: {}]   ;;  %s2008_s5 = inlined_call_operand.hbm [shape: f32[32,64], index: 5, kind: input, shape index: {}]   ;;  %s2009_s6 = inlined_call_operand.vmem [shape: f32[1,64], index: 6, kind: input, shape index: {}]   ;;  %s2010_s7 = inlined_call_operand.vmem [shape: f32[64,32], index: 7, kind: input, shape index: {}]   ;;  %s2011_s8 = inlined_call_operand.hbm [shape: f32[16,32], index: 8, kind: input, shape index: {}]   ;;  %s2012_s9 = inlined_call_operand.vmem [shape: f32[1,32], index: 9, kind: input, shape index: {}]   ;;  %s2013_s10 = inlined_call_operand.vmem [shape: f32[8,32], index: 10, kind: input, shape index: {}]   ;;  %s2014_s11 = inlined_call_operand.hbm [shape: f32[4,1,8], index: 11, kind: output, shape index: {}]  }
   0x1   :  { %17 = vsyncpa [#allocation6], 0 }
   0x2   :  { %18 = vsyncpa [#allocation4], 0 }
   0x3   :  { %20 = vsyncpa [#allocation4 + $0x1], 0  ;;  %s1727_s17 = smov 0   ;;  %s1729_s18 = smov 0  }
   0x4   :  { %s1731_s19 = smov 0   ;;  %s1733_s20 = smov 0  }
   0x5 LB: > { %2018 = sst [smem:[#allocation12_spill]] %s1650_s19  ;;  %s1748_s21 = sadd.s32 4294967295, %s1654_s20   ;;  %s1654_s20 = sphi %s1733_s20, %s2034_s20   ;;  %s1650_s19 = sphi %s1731_s19, %s2031_s19   ;;  %s1646_s18 = sphi %s1729_s18, %s2033_s18   ;;  %s1642_s17 = sphi %s1727_s17, %s2032_s17  }
   0x6   : > { %s1281_s22 = sadd.s32 4294967294, %s1654_s20   ;;  %s1752_s23 = sadd.s32 1, %s1654_s20  }
   0x7   : > { %s274_s24 = sadd.s32 1, %s1650_s19  ;;  %s271_s25 = ssub.s32 %s1654_s20, %s1752_s23 }
   0x8   : > { %p284_p0 = scmp.ne.s32.totalorder %s1650_s19, %s1646_s18  ;;  %p272_p1 = scmp.eq.s32.totalorder %s271_s25, 0 }
   0x9   : > { %p285_p2 = scmp.eq.s32.totalorder %s1748_s21, 3  ;;  %p290_p3 = scmp.ne.s32.totalorder %s1646_s18, %s1642_s17 }
   0xa   : > { %p291_p4 = scmp.eq.s32.totalorder %s1281_s22, 3  ;;  %p1282_p7 = scmp.ge.s32.totalorder %s1654_s20, 1 }
   0xb   : > { %s1763_s26 = scalar_select %p272_p1, %s1650_s19, %s274_s24  }
   0xc   : > { %p1765_p5 = por %p285_p2, %p284_p0  ;;  %p1769_p6 = por %p291_p4, %p290_p3 }
   0xd   : > { %2019 = sst [smem:[#allocation13_spill]] %s1763_s26  ;;  %p298_p8 = scmp.lt.s32.totalorder %s1654_s20, 5 }
   0xe   : > { %s2020_s27 = scalar_select %p1765_p5, 1, 0 }
   0xf   : > { %s2021_s28 = scalar_select %p1769_p6, 1, 0 }
  0x10   : > { %p2015_p9 = scmp.eq.s32.totalorder %s1748_s21, 0  ;;  %p1776_p10 = pnand %p1282_p7, %p298_p8 }
  0x11   : > { %s1656_s30 = smov [#allocation5]   ;;  %s1657_s14 = smov [#allocation2]  }
  0x12   : > { %p1436_p11 = pneg %p1776_p10  ;;  %s329_s12 = sshll.u32 %s1656_s30, 4  ;;  %s330_s12 = int_to_ptr.vmem [resolvable:$true] %s329_s12 }
  0x13   : > { %s316_s15 = sshll.u32 %s1657_s14, 4  ;;  %s1658_s16 = smov [#allocation7]   ;;  %s317_s15 = int_to_ptr.vmem [resolvable:$true] %s316_s15 }
  0x14   : > { %p1784_p12 = pnand %p2015_p9, %p1436_p11  ;;  %s348_s22 = sshll.u32 %s1658_s16, 4  ;;  %s349_s22 = int_to_ptr.vmem [resolvable:$true] %s348_s22 }
  0x15   : > { %s1519_s24 = scalar_lea.vmem %s330_s12, 512  ;;  %p1527_p3 = scmp.lt.s32.totalorder %s330_s12, %s330_s12 }
  0x16   : > { %p1510_p13 = pneg %p1784_p12  ;;  %p1520_p0 = scmp.ne.s32.totalorder %s330_s12, %s1519_s24 }
  0x17   : > { %p1528_p4 = scmp.lt.s32.totalorder %s1519_s24, %s1519_s24 }
  0x18   : > { %p1522_p1 = pnand %p1520_p0, %p1510_p13 }
  0x19   : > { %p1529_p7 = por %p1528_p4, %p1527_p3 }
  0x1a   : > { %p1523_p2 = pneg %p1522_p1 }
  0x1c   : > { %p1530_p8 = pnand %p1529_p7, %p1523_p2 }
  0x1e   : > { %1533 = shalt.err (!%p1530_p8)
}
  0x1f   : > { %s1659_s25 = smov 128   ;;  %s1660_s30 = smov 8  }
  0x20   : > { %1442 = dma.hbm_to_vmem [thread:$0]  (!%p1784_p12), %s2008_s5, 512, %s330_s12, [#allocation6], %s1659_s25, %s1659_s25, %s1660_s30  }
  0x21   : > { %s1545_s26 = scalar_lea.vmem %s317_s15, 512  ;;  %p1553_p9 = scmp.lt.s32.totalorder %s317_s15, %s317_s15 }
  0x22   : > { %p1546_p11 = scmp.ne.s32.totalorder %s317_s15, %s1545_s26  ;;  %p1554_p6 = scmp.lt.s32.totalorder %s1545_s26, %s1545_s26 }
  0x24   : > { %p1548_p0 = pnand %p1546_p11, %p1510_p13  ;;  %p1555_p3 = por %p1554_p6, %p1553_p9 }
  0x26   : > { %p1549_p1 = pneg %p1548_p0 }
  0x28   : > { %p1556_p2 = pnand %p1555_p3, %p1549_p1 }
  0x2a   : > { %1559 = shalt.err (!%p1556_p2)
}
  0x2b   : > { %1439 = dma.hbm_to_vmem [thread:$0]  (!%p1784_p12), %s2007_s4, 512, %s317_s15, [#allocation3], %s1659_s25, %s1659_s25, %s1660_s30  }
  0x2c   : > { %s1571_s12 = scalar_lea.vmem %s349_s22, 256  ;;  %p1579_p11 = scmp.lt.s32.totalorder %s349_s22, %s349_s22 }
  0x2d   : > { %p1572_p4 = scmp.ne.s32.totalorder %s349_s22, %s1571_s12  ;;  %p1580_p0 = scmp.lt.s32.totalorder %s1571_s12, %s1571_s12 }
  0x2f   : > { %p1574_p7 = pnand %p1572_p4, %p1510_p13  ;;  %p1581_p5 = por %p1580_p0, %p1579_p11 }
  0x31   : > { %p1575_p8 = pneg %p1574_p7 }
  0x33   : > { %p1582_p6 = pnand %p1581_p5, %p1575_p8 }
  0x35   : > { %1585 = shalt.err (!%p1582_p6)
}
  0x36   : > { %1445 = dma.hbm_to_vmem [thread:$0]  (!%p1784_p12), %s2011_s8, 256, %s349_s22, [#allocation6], %s1659_s25, %s1659_s25, %s1660_s30  }
  0x37   : > { %384 = sbr.rel (%p1776_p10) target bundleno = 2507 (0x9cb), region = 64  ;;  %p2024_p9 = scmp.eq.s32.totalorder (!%p1776_p10), %s1748_s21, 0 }
  0x3c   : > { %1629 = dma.done.wait (%p2024_p9), [#allocation3], 512   ;;  %p2025_p13 = pmov %p2024_p9 }
  0x3d   : > { %p2026_p1 = pmov %p2024_p9 }
  0x3e   : > { %1631 = vsyncadd (%p2025_p13), [#allocation3], 4294966784 }
  0x3f   : > { %1633 = dma.done.wait (%p2026_p1), [#allocation6], 768   ;;  %p2027_p5 = pmov %p2026_p1 }
  0x40   : > { %p434_p3 = scmp.lt.s32.totalorder %s1748_s21, 3  ;;  %v1661_v0 = vmov 0.0   ;;  %vm1662_vm0 = vmmov 0   ;;  %v446_v1 = vld [vmem:[%s2005_s2 + $0x18] sm:$0xff]  ;;  %v445_v2 = vld [vmem:[%s2005_s2 + $0x10] sm:$0xff]  ;;  %v444_v3 = vld [vmem:[%s2005_s2 + $0x8] sm:$0xff] }
  0x41   : > { %1635 = vsyncadd (%p2027_p5), [#allocation6], 4294966528  ;;  %1348 = vmatprep.subr.mxu0 %v1661_v0  ;;  %1356 = vmatprep.mubr.msk.f32.mxu0 %vm1662_vm0, %v1661_v0  ;;  %v443_v4 = vld [vmem:[%s2005_s2] sm:$0xff]  ;;  %vm454_vm1 = vcmask 261120   ;;  %s1663_s25 = smov 96   ;;  %vm606_vm2 = vcmask 64512  }
  0x42   : > { %s1829_s19 = scalar_select %p434_p3, %s1748_s21, 3  ;;  %1359 = vmatprep.subr.mxu1 %v1661_v0  ;;  %1361 = vmatprep.mubr.msk.f32.mxu1 %vm1662_vm0, %v1661_v0  ;;  %v1293_v6 = vld [vmem:[%s2006_s3] ss:$0 sm:$0xff]  ;;  %v697_v20 = vld [vmem:[#allocation2 + $0x18] sm:$0xff]  ;;  %v696_v21 = vld [vmem:[#allocation2 + $0x10] sm:$0xff]  ;;  %vm901_vm3 = vcmask 523264  }
  0x43   : > { %1349 = vmatpush3.msra.mxu0 %v446_v1  ;;  %s1664_s30 = smov 64   ;;  %v695_v22 = vld [vmem:[#allocation2 + $0x8] sm:$0xff]  ;;  %v694_v27 = vld [vmem:[#allocation2] sm:$0xff]  ;;  %v806_v41 = vld [vmem:[#allocation5 + $0x18] sm:$0xff]  ;;  %vm1009_vm4 = vcmask 130048   ;;  %s432_s22 = sand.u32 1, %s1646_s18  }
  0x44   : > { %s1291_s29 = sshll.u32 %s1829_s19, 3  ;;  %1350 = vmatprep.subr.mxu0 %v1661_v0  ;;  %v1298_v30 = vld [vmem:[%s2013_s10] ss:$0 sm:$0xff]  ;;  %v805_v42 = vld [vmem:[#allocation5 + $0x10] sm:$0xff]  ;;  %v804_v43 = vld [vmem:[#allocation5 + $0x8] sm:$0xff]  ;;  %s1312_s19 = sshll.u32 %s1748_s21, 4 }
  0x45   : > { %s437_s26 = scalar_lea.vmem %s2003_s0, %s1291_s29  ;;  %1351 = vmatpush3.msra.mxu0 %v445_v2  ;;  %v803_v44 = vld [vmem:[#allocation5] sm:$0xff]  ;;  %v895_v45 = vld [vmem:[%s2010_s7 + $0x38] sm:$0xff]  ;;  %v894_v46 = vld [vmem:[%s2010_s7 + $0x30] sm:$0xff]  ;;  %s441_s15 = scalar_lea.vmem %s2004_s1, %s1291_s29  ;;  %vm1168_vm5 = vcmask 57344  }
  0x46   : > { %1352 = vmatprep.subr.mxu0 %v1661_v0  ;;  %v442_v5 = vld [vmem:[%s437_s26] sm:$0xff]  ;;  %v893_v47 = vld [vmem:[%s2010_s7 + $0x28] sm:$0xff]  ;;  %v891_v49 = vld [vmem:[%s2010_s7 + $0x18] sm:$0xff]  ;;  %s433_s29 = scalar_lea.vmem [#allocation8], %s432_s22  ;;  %s1968_s24 = scalar_lea.hbm %s2014_s11, %s1312_s19 }
  0x47   : > { %1353 = vmatpush3.msra.mxu0 %v444_v3  ;;  %v892_v48 = vld [vmem:[%s2010_s7 + $0x20] sm:$0xff]  ;;  %v890_v59 = vld [vmem:[%s2010_s7 + $0x10] sm:$0xff]  ;;  %v889_v60 = vld [vmem:[%s2010_s7 + $0x8] sm:$0xff]  ;;  %s1171_s12 = scalar_lea.sflag [#allocation4], %s432_s22  ;;  %p2028_p12 = scmp.ne.s32.totalorder %s2020_s27, 0 }
  0x48   : > { %1354 = vmatprep.subr.mxu0 %v1661_v0  ;;  %v1300_v54 = vld [vmem:[%s2013_s10 + $0x1] ss:$0 sm:$0xff]  ;;  %v1301_v56 = vld [vmem:[%s2013_s10 + $0x2] ss:$0 sm:$0xff]  ;;  %v1302_v62 = vld [vmem:[%s2009_s6] ss:$0 sm:$0xff] }
  0x49   : > { %1355 = vmatpush3.msra.mxu0 %v443_v4  ;;  %v888_v61 = vld [vmem:[%s2010_s7] sm:$0xff]  ;;  %v1003_v4 = vld [vmem:[#allocation7 + $0x8] sm:$0xff]  ;;  %s1666_s21 = smov [#allocation8]  }
  0x4a   : > { %1357 = vmatmul.mubr.msk.f32.vlgmr.msra.gmra.mxu0 %vm454_vm1, %v442_v5  ;;  %1369 = vmatprep.subr.mxu0 %v1661_v0  ;;  %s1590_s14 = sshll.u32 %s1666_s21, 4  ;;  %s1591_s14 = int_to_ptr.vmem [resolvable:$false] %s1590_s14 }
  0x4b   : > { %1377 = vmatprep.mubr.msk.f32.mxu0 %vm1662_vm0, %v1661_v0  ;;  %1370 = vmatpush3.msra.mxu0 %v697_v20  ;;  %v1665_v20 = vmov 0   ;;  %s1592_s13 = scalar_lea.vmem %s1591_s14, 32 }
  0x4c   : > { %1371 = vmatprep.subr.mxu0 %v1661_v0  ;;  %1499 = vset.pattern.permute.xlu0 %v1665_v20 }
  0x4d   : > { %1372 = vmatpush3.msra.mxu0 %v696_v21 }
  0x4e   : > { %1373 = vmatprep.subr.mxu0 %v1661_v0 }
  0x4f   : > { %1374 = vmatpush3.msra.mxu0 %v695_v22 }
  0x50   : > { %1375 = vmatprep.subr.mxu0 %v1661_v0 }
  0x51   : > { %1376 = vmatpush3.msra.mxu0 %v694_v27  ;;  %v1306_v27 = vld [vmem:[%s2013_s10 + $0x4] ss:$0 sm:$0xff] }
  0x52   : > { %1391 = vmatprep.subr.mxu0 %v1661_v0 }
 0x10a   : > { %v524_v7 = vpop.f32.mrf.mxu0 }
 0x10b   : > { %v525_v8 = vadd.f32 %v1293_v6, %v524_v7  ;;  %v1001_v6 = vld [vmem:[%s441_s15] sm:$0xff] }
 0x10c   : > { %v1358_v9 = vpop.f32.mrf.mxu0  ;;  %v1304_v7 = vld [vmem:[%s2013_s10 + $0x3] ss:$0 sm:$0xff] }
 0x10d   : > { %529 = vrot.lane.b32.xlu0 %v525_v8, %s1663_s25  ;;  %s1183_s25 = sshll.u32 %s433_s29, 4  ;;  %s1184_s25 = int_to_ptr.vmem [resolvable:$true] %s1183_s25 }
 0x10e   : > { %s1586_s26 = scalar_lea.vmem %s1184_s25, 16  ;;  %p1593_p7 = scmp.lt.s32.totalorder %s1184_s25, %s1591_s14 }
 0x10f   : > { %p1587_p10 = scmp.ne.s32.totalorder %s1184_s25, %s1586_s26  ;;  %p1594_p8 = scmp.lt.s32.totalorder %s1592_s13, %s1586_s26 }
 0x111   : > { %p1588_p2 = pnand %p1587_p10, %p2028_p12  ;;  %p1595_p11 = por %p1594_p8, %p1593_p7 }
 0x113   : > { %p1589_p4 = pneg %p1588_p2 }
 0x115   : > { %p1596_p0 = pnand %p1595_p11, %p1589_p4 }
 0x17f   : > { %v530_v10 = vpop.permute.xlu0 %529 }
 0x180   : > { %1360 = vmatpush3.xpose.msk.msra.mxu1 %vm454_vm1, %v530_v10 }
 0x181   : > { %1364 = vmatprep.subr.mxu1 %v1661_v0 }
 0x183   : > { %1362 = vmatmul.mubr.msk.f32.vlgmr.msra.gmra.mxu1 %vm454_vm1, %v525_v8 }
 0x184   : > { %1366 = vmatprep.mubr.msk.f32.mxu1 %vm1662_vm0, %v1661_v0 }
 0x243   : > { %v601_v11 = vpop.f32.mrf.mxu1 }
 0x244   : > { %v605_v12 = vmul.f32 0.17677669, %v601_v11 }
 0x245   : > { %v1363_v13 = vpop.f32.mrf.mxu1 }
 0x246   : > { %v607_v14 = vsel %vm606_vm2, %v605_v12, -inf }
 0x247   : > { %608 = vmax.xlane.f32.xlu0 %v607_v14 }
 0x2d0   : > { %v609_v15 = vpop.xlane.xlu0 %608 }
 0x2d1   : > { %v610_v16 = vsub.f32 %v605_v12, %v609_v15 }
 0x2d3   : > { %v611_v17 = vmul.f32 1.442695, %v610_v16 }
 0x2d5   : > { %1500 = vpow2.f32 %v611_v17 }
 0x2e2   : > { %v1501_v18 = vpop.eup %1500 }
 0x2e3   : > { %v613_v19 = vsel %vm606_vm2, %v1501_v18, 0.0 }
 0x2e4   : > { %614 = vadd.xlane.f32.xlu1 %v613_v19  ;;  %v1085_v19 = vld [vmem:[%s2013_s10 + $0x7] sm:$0x1] }
 0x2f5   : > { %618 = vrot.lane.b32.xlu1 %v525_v8, %s1664_s30 }
 0x36d   : > { %v615_v23 = vpop.xlane.xlu1 %614 }
 0x36e   : > { %1502 = vrcp.f32 %v615_v23 }
 0x371   : > { %v619_v24 = vpop.permute.xlu1 %618 }
 0x372   : > { %1365 = vmatpush3.msra.mxu1 %v619_v24  ;;  %v1308_v24 = vld [vmem:[%s2013_s10 + $0x6] ss:$0 sm:$0xff] }
 0x373   : > { %1380 = vmatprep.subr.mxu1 %v1661_v0 }
 0x37b   : > { %v1503_v25 = vpop.eup %1502 }
 0x37c   : > { %v617_v26 = vmul.f32 %v1503_v25, %v1501_v18 }
 0x37e   : > { %1367 = vmatmul.mubr.msk.f32.vlgmr.msra.gmra.mxu1 %vm606_vm2, %v617_v26 }
 0x37f   : > { %1388 = vmatprep.mubr.msk.f32.mxu1 %vm1662_vm0, %v1661_v0  ;;  %1381 = vmatpush3.msra.mxu1 %v806_v41 }
 0x380   : > { %1382 = vmatprep.subr.mxu1 %v1661_v0 }
 0x381   : > { %1383 = vmatpush3.msra.mxu1 %v805_v42 }
 0x382   : > { %1384 = vmatprep.subr.mxu1 %v1661_v0 }
 0x383   : > { %1385 = vmatpush3.msra.mxu1 %v804_v43 }
 0x384   : > { %1386 = vmatprep.subr.mxu1 %v1661_v0 }
 0x385   : > { %1387 = vmatpush3.msra.mxu1 %v803_v44 }
 0x386   : > { %1410 = vmatprep.subr.mxu1 %v1661_v0 }
 0x43e   : > { %v690_v28 = vpop.f32.mrf.mxu1 }
 0x43f   : > { %1378 = vmatmul.mubr.msk.f32.vlgmr.msra.gmra.mxu0 %vm454_vm1, %v690_v28 }
 0x440   : > { %v1368_v29 = vpop.f32.mrf.mxu1  ;;  %1407 = vmatprep.mubr.msk.f32.mxu0 %vm1662_vm0, %v1661_v0  ;;  %1392 = vmatpush3.msra.mxu0 %v895_v45 }
 0x441   : > { %1393 = vmatprep.subr.mxu0 %v1661_v0  ;;  %v1307_v29 = vld [vmem:[%s2013_s10 + $0x5] ss:$0 sm:$0xff] }
 0x442   : > { %1394 = vmatpush3.msra.mxu0 %v894_v46 }
 0x443   : > { %1395 = vmatprep.subr.mxu0 %v1661_v0 }
 0x444   : > { %1396 = vmatpush3.msra.mxu0 %v893_v47 }
 0x445   : > { %1397 = vmatprep.subr.mxu0 %v1661_v0 }
 0x446   : > { %1398 = vmatpush3.msra.mxu0 %v892_v48 }
 0x447   : > { %1399 = vmatprep.subr.mxu0 %v1661_v0 }
 0x448   : > { %1400 = vmatpush3.msra.mxu0 %v891_v49 }
 0x449   : > { %1401 = vmatprep.subr.mxu0 %v1661_v0 }
 0x44a   : > { %1402 = vmatpush3.msra.mxu0 %v890_v59 }
 0x44b   : > { %1403 = vmatprep.subr.mxu0 %v1661_v0 }
 0x44c   : > { %1404 = vmatpush3.msra.mxu0 %v889_v60 }
 0x44d   : > { %1405 = vmatprep.subr.mxu0 %v1661_v0 }
 0x44e   : > { %1406 = vmatpush3.msra.mxu0 %v888_v61 }
 0x4ff   : > { %v772_v31 = vpop.f32.mrf.mxu0 }
 0x500   : > { %v773_v32 = vadd.f32 %v1298_v30, %v772_v31 }
 0x501   : > { %v1379_v33 = vpop.f32.mrf.mxu0 }
 0x502   : > { %v776_v34 = vadd.f32 %v773_v32, %v442_v5  ;;  %v1002_v5 = vld [vmem:[#allocation7] sm:$0xff] }
 0x504   : > { %v777_v35 = vsel %vm454_vm1, %v776_v34, 0.0 }
 0x505   : > { %778 = vadd.xlane.f32.xlu1 %v777_v35 }
 0x58e   : > { %v779_v36 = vpop.xlane.xlu1 %778 }
 0x58f   : > { %v781_v37 = vmul.f32 0.03125, %v779_v36 }
 0x591   : > { %v782_v38 = vsub.f32 %v776_v34, %v781_v37  ;;  %v1086_v34 = vld [vmem:[%s2012_s9] sm:$0x1] }
 0x593   : > { %v783_v39 = vmul.f32 %v782_v38, %v782_v38 }
 0x595   : > { %v784_v40 = vsel %vm454_vm1, %v783_v39, 0.0 }
 0x596   : > { %785 = vadd.xlane.f32.xlu0 %v784_v40 }
 0x61f   : > { %v786_v50 = vpop.xlane.xlu0 %785 }
 0x620   : > { %v787_v51 = vmul.f32 0.03125, %v786_v50 }
 0x622   : > { %v788_v52 = vadd.f32 1e-05, %v787_v51 }
 0x624   : > { %1504 = vrsqrt.f32 %v788_v52 }
 0x631   : > { %v1505_v53 = vpop.eup %1504 }
 0x632   : > { %v790_v55 = vmul.f32 %v1505_v53, %v782_v38 }
 0x634   : > { %v796_v57 = vmul.f32 %v1300_v54, %v790_v55 }
 0x636   : > { %v802_v58 = vadd.f32 %v1301_v56, %v796_v57 }
 0x638   : > { %1389 = vmatmul.mubr.msk.f32.vlgmr.msra.gmra.mxu1 %vm454_vm1, %v802_v58 }
 0x639   : > { %1414 = vmatprep.mubr.msk.f32.mxu1 %vm1662_vm0, %v1661_v0  ;;  %1411 = vmatpush3.msra.mxu1 %v1003_v4 }
 0x63a   : > { %1412 = vmatprep.subr.mxu1 %v1661_v0 }
 0x63b   : > { %1413 = vmatpush3.msra.mxu1 %v1002_v5 }
 0x63c   : > { %1415 = vmatmul.mubr.msk.f32.vlgmr.msra.gmra.mxu1 %vm1009_vm4, %v1001_v6  ;;  %1417 = vmatprep.subr.mxu1 %v1661_v0 }
 0x63d   : > { %1419 = vmatprep.mubr.msk.f32.mxu1 %vm1662_vm0, %v1661_v0 }
 0x6f8   : > { %v883_v63 = vpop.f32.mrf.mxu1 }
 0x6f9   : > { %v884_v1 = vadd.f32 %v1302_v62, %v883_v63 }
 0x6fa   : > { %v1390_v2 = vpop.f32.mrf.mxu1 }
 0x6fb   : > { %v887_v3 = vmax.f32 %v884_v1, 0.0 }
 0x6fc   : > { %v1079_v18 = vpop.f32.mrf.mxu1 }
 0x6fd   : > { %1408 = vmatmul.mubr.msk.f32.vlgmr.msra.gmra.mxu0 %vm901_vm3, %v887_v3  ;;  %v1080_v25 = vadd.f32 %v1308_v24, %v1079_v18 }
 0x6fe   : > { %v1416_v0 = vpop.f32.mrf.mxu1 }
 0x6ff   : > { %v1083_v31 = vmax.f32 %v1080_v25, 0.0 }
 0x7bd   : > { %v971_v8 = vpop.f32.mrf.mxu0 }
 0x7be   : > { %v972_v9 = vadd.f32 %v1304_v7, %v971_v8 }
 0x7bf   : > { %v1409_v10 = vpop.f32.mrf.mxu0 }
 0x7c0   : > { %v975_v11 = vadd.f32 %v972_v9, %v802_v58 }
 0x7c2   : > { %v976_v12 = vsel %vm454_vm1, %v975_v11, 0.0 }
 0x7c3   : > { %977 = vadd.xlane.f32.xlu0 %v976_v12 }
 0x84c   : > { %v978_v13 = vpop.xlane.xlu0 %977 }
 0x84d   : > { %v979_v14 = vmul.f32 0.03125, %v978_v13 }
 0x84f   : > { %v980_v15 = vsub.f32 %v975_v11, %v979_v14 }
 0x851   : > { %v981_v16 = vmul.f32 %v980_v15, %v980_v15 }
 0x853   : > { %v982_v17 = vsel %vm454_vm1, %v981_v16, 0.0 }
 0x854   : > { %983 = vadd.xlane.f32.xlu0 %v982_v17 }
 0x86a   : > { %1089 = vperm.xlu0 %1499, %v1085_v19  }
 0x8dd   : > { %v984_v21 = vpop.xlane.xlu0 %983 }
 0x8de   : > { %v985_v22 = vmul.f32 0.03125, %v984_v21 }
 0x8e0   : > { %v986_v23 = vadd.f32 1e-05, %v985_v22 }
 0x8e2   : > { %1506 = vrsqrt.f32 %v986_v23 }
 0x8e5   : > { %v1090_v35 = vpop.permute.xlu0 %1089 }
 0x8ef   : > { %v1507_v26 = vpop.eup %1506 }
 0x8f0   : > { %v988_v28 = vmul.f32 %v1507_v26, %v980_v15 }
 0x8f2   : > { %v994_v30 = vmul.f32 %v1306_v27, %v988_v28 }
 0x8f4   : > { %v1000_v32 = vadd.f32 %v1307_v29, %v994_v30 }
 0x8f6   : > { %v1084_v33 = vadd.f32 %v1083_v31, %v1000_v32 }
 0x8f8   : > { %1418 = vmatpush3.xpose.msk.msra.mxu1 %vm454_vm1, %v1084_v33 }
 0x8fb   : > { %1420 = vmatmul.mubr.msk.f32.vlgmr.msra.gmra.mxu1 %vm454_vm1, %v1086_v34 }
 0x9bb   : > { %v1164_v36 = vpop.f32.mrf.mxu1 }
 0x9bc   : > { %v1165_v37 = vadd.f32 %v1164_v36, %v1090_v35 }
 0x9bd   : > { %v1421_v38 = vpop.f32.mrf.mxu1 }
 0x9be   : > { %1169 = vst.msk [vmem:[%s433_s29] sm:$0x1] %vm1168_vm5, %v1165_v37 }
 0x9bf   : > { %1599 = shalt.err (!%p1596_p0)
}
 0x9c0   : > { %s1600_s15 = scalar_lea.hbm %s1968_s24, 16  ;;  %s1604_s29 = scalar_lea.hbm %s2014_s11, 64 }
 0x9c1   : > { %p1601_p6 = scmp.ne.s32.totalorder %s1968_s24, %s1600_s15  ;;  %p1605_p1 = scmp.lt.s32.totalorder %s1968_s24, %s2014_s11 }
 0x9c2   : > { %p1606_p5 = scmp.lt.s32.totalorder %s1604_s29, %s1600_s15 }
 0x9c3   : > { %p1602_p9 = pnand %p1601_p6, %p2028_p12 }
 0x9c4   : > { %p1607_p3 = por %p1606_p5, %p1605_p1 }
 0x9c5   : > { %p1603_p13 = pneg %p1602_p9 }
 0x9c7   : > { %p1608_p10 = pnand %p1607_p3, %p1603_p13 }
 0x9c9   : > { %1611 = shalt.err (!%p1608_p10)
}
 0x9ca   : > { %1434 = dma.vmem_to_hbm [thread:$0]  (%p2028_p12), %s1184_s25, 16, %s1968_s24, %s1171_s12  }
 0x9cb PF: > { %p1456_p2 = scmp.ge.s32.totalorder %s1654_s20, 2  ;;  %s1195_s26 = sand.u32 1, %s1642_s17  }
 0x9cc   : > { %p2029_p4 = scmp.ne.s32.totalorder %s2021_s28, 0  ;;  %s1196_s21 = scalar_lea.sflag [#allocation4], %s1195_s26 }
 0x9ce   : > { %p1447_p7 = pnand %p1456_p2, %p2029_p4 }
 0x9d0   : > { %p1448_p8 = pneg %p1447_p7 }
 0x9d2   : > { %1637 = dma.done.wait (%p1448_p8), %s1196_s21, 16  }
 0x9d3   : > { %1639 = vsyncadd (%p1448_p8), %s1196_s21, 4294967280  ;;  %s2030_s14 = sld [smem:[#allocation12_spill]]  ;;  %p23_p11 = scmp.ge.s32.totalorder %s1752_s23, 6  }
 0x9d4   : > { %s2031_s19 = sld [smem:[#allocation13_spill]]  ;;  %s2032_s17 = smov %s1646_s18 }
 0x9d5   : > { %s2034_s20 = smov %s1752_s23  ;;  %25 = sbr.rel (!%p23_p11) target bundleno = 5 (0x5), region = 115 }
 0x9d9   : > { %s2033_s18 = smov %s2030_s14 }
 0x9da   :  { %1200 = vsyncpa [#allocation3], 1 }
 0x9db   :  { %1202 = vsyncpa [#allocation3 + $0x1], 1 }
 0x9dc   :  { %1203 = vsyncpa [#allocation6], 1 }
 0x9dd   :  { %1204 = vsyncpa [#allocation4], 1 }
 0x9de   :  { %1206 = vsyncpa [#allocation4 + $0x1], 1 }

</bundles_post_ra>
